<compile_context>
chip_gen: v5e
topology: v5e:2x2
jax: 0.10.0
libtpu: 0.0.40
codegen_flags: <defaults>
</compile_context>

<pallas_src>
import functools

import jax
import jax.numpy as jnp
from jax.experimental import pallas as pl
from jax.experimental.pallas import tpu as pltpu


def _round_up(a, m):
    return ((a + m - 1) // m) * m


def _gamma_single_tile_kernel(x_ref, w_ref, b_ref, o_ref, *,
                              n_total, tile_n, needs_mask):
    """Fast path: the whole N reduction fits in one tile (real n=8 workload).

    x_ref: (tile_n, 128)   w_ref: (128, 128) (out,in)   b_ref: (1, 128)
    o_ref: (1, 128)
    """
    x = x_ref[...].astype(jnp.float32)
    if needs_mask:
        row = jax.lax.broadcasted_iota(jnp.int32, x.shape, 0)
        x = jnp.where(row < n_total, x, 0.0)
    # VPU fold to 8 sublanes, then a single XLU 8->1 reduce.
    part = x.reshape(tile_n // 8, 8, 128).sum(axis=0)
    mean_x = jnp.sum(part, axis=0, keepdims=True) * (1.0 / n_total)
    # fc1: y = mean(x) @ W^T + b; MXU contracts against the untransposed
    # (out, in) weight natively.
    y = jax.lax.dot_general(mean_x, w_ref[...],
                            dimension_numbers=(((1,), (1,)), ((), ())),
                            preferred_element_type=jnp.float32)
    o_ref[...] = (y + b_ref[...].astype(jnp.float32)).astype(o_ref.dtype)


def _gamma_multi_tile_kernel(x_ref, w_ref, b_ref, o_ref, acc_ref, *,
                             n_total, tile_n, tiles_per_split, any_padding):
    """Streaming path.  grid = (B, S, tiles_per_split); acc_ref: (8,128) f32."""
    s = pl.program_id(1)   # split index along the (optionally) partitioned N
    i = pl.program_id(2)   # tile index within this split

    @pl.when(i == 0)
    def _init():
        acc_ref[...] = jnp.zeros_like(acc_ref)

    # Logical (unclamped) first global row of this tile.
    start = (s * tiles_per_split + i) * tile_n

    def _accumulate(masked):
        x = x_ref[...].astype(jnp.float32)
        if masked:
            row = start + jax.lax.broadcasted_iota(jnp.int32, x.shape, 0)
            x = jnp.where(row < n_total, x, 0.0)
        # Pure-VPU partial reduce: fold tile_n rows into 8 sublanes.
        acc_ref[...] += x.reshape(tile_n // 8, 8, 128).sum(axis=0)

    if any_padding:
        # Mask only tiles that actually cross the N boundary; interior tiles
        # take the cheap unmasked accumulate (keeps v7x HBM-bound).
        @pl.when(start + tile_n <= n_total)
        def _full_tile():
            _accumulate(masked=False)

        @pl.when(start + tile_n > n_total)
        def _ragged_tile():
            _accumulate(masked=True)
    else:
        _accumulate(masked=False)

    @pl.when(i == pl.num_programs(2) - 1)
    def _finalize():
        # One 8->1 XLU reduce, one tiny MXU matmul, bias added exactly once
        # (by split 0); the wrapper sums the per-split partials.
        mean_x = jnp.sum(acc_ref[...], axis=0, keepdims=True) * (1.0 / n_total)
        y = jax.lax.dot_general(mean_x, w_ref[...],
                                dimension_numbers=(((1,), (1,)), ((), ())),
                                preferred_element_type=jnp.float32)
        bias_scale = (s == 0).astype(jnp.float32)
        o_ref[...] = (y + b_ref[...].astype(jnp.float32) * bias_scale
                      ).astype(o_ref.dtype)


def gamma_forward(x, weight, bias, *, tile_n=4096, num_splits=None):
    """Gamma forward.

    x:      (n, 128) or (B, n, 128)
    weight: (128, 128) in PyTorch (out, in) layout (NOT pre-transposed)
    bias:   (128,)
    returns (128,) or (B, 128) in float32

    tile_n:     rows of x streamed per grid step (production callers should
                keep the large default; tiny values are for tests only).
    num_splits: split the N reduction across TensorCores (None = auto:
                2 when B == 1 and N is large, else 1).
    """
    squeeze = (x.ndim == 2)
    if squeeze:
        x = x[None]                     # (1, n, 128)
    B, n, d = x.shape
    assert d == 128 and weight.shape == (128, 128) and bias.shape == (128,)

    # Row alignment per dtype packing: 8 rows (f32), 16 (bf16), 32 (int8).
    row_align = max(8, 32 // jnp.dtype(x.dtype).itemsize)

    tn = (max(int(tile_n), row_align) // row_align) * row_align
    tn = min(tn, _round_up(n, row_align))
    num_tiles = pl.cdiv(n, tn)

    bias2d = bias.reshape(1, 128)

    if num_tiles == 1:
        # ---------- single-tile fast path (covers the real n=8, B=1 case) ----
        kernel = functools.partial(
            _gamma_single_tile_kernel,
            n_total=n, tile_n=tn, needs_mask=(tn != n))
        out = pl.pallas_call(
            kernel,
            out_shape=jax.ShapeDtypeStruct((B, 128), jnp.float32),
            grid_spec=pltpu.PrefetchScalarGridSpec(
                num_scalar_prefetch=0,
                grid=(B,),
                in_specs=[
                    pl.BlockSpec((None, tn, 128), lambda b: (b, 0, 0)),
                    pl.BlockSpec((128, 128), lambda b: (0, 0)),
                    pl.BlockSpec((1, 128), lambda b: (0, 0)),
                ],
                out_specs=pl.BlockSpec((1, 128), lambda b: (b, 0)),
            ),
            compiler_params=pltpu.CompilerParams(
                dimension_semantics=("parallel",)),
        )(x, weight, bias2d)
        return out[0] if squeeze else out

    # ---------- multi-tile streaming path ------------------------------------
    if num_splits is None:
        # Use both TensorCores (v7x) for the reduction only when there is no
        # batch parallelism and enough tiles to stream; on 1-TC chips the
        # extra "parallel" axis just serializes (negligible overhead).
        num_splits = 2 if (B == 1 and num_tiles >= 4) else 1
    S = max(1, min(int(num_splits), num_tiles))
    tiles_per_split = pl.cdiv(num_tiles, S)
    last_block = num_tiles - 1
    any_padding = (S * tiles_per_split * tn) > n

    kernel = functools.partial(
        _gamma_multi_tile_kernel,
        n_total=n, tile_n=tn, tiles_per_split=tiles_per_split,
        any_padding=any_padding)

    def x_index_map(b, s_, i):
        # Clamp so over-padded splits never DMA past the array; those rows are
        # zeroed by the ragged-tile mask anyway.
        j = s_ * tiles_per_split + i
        return (b, jnp.minimum(j, last_block), 0)

    partials = pl.pallas_call(
        kernel,
        out_shape=jax.ShapeDtypeStruct((B, S, 128), jnp.float32),
        grid_spec=pltpu.PrefetchScalarGridSpec(
            num_scalar_prefetch=0,
            grid=(B, S, tiles_per_split),
            in_specs=[
                # x: one (tile_n, 128) tile per step; batch dim squeezed.
                pl.BlockSpec((None, tn, 128), x_index_map),
                # weight / bias: same block every step -> VMEM-resident.
                pl.BlockSpec((128, 128), lambda b, s_, i: (0, 0)),
                pl.BlockSpec((1, 128), lambda b, s_, i: (0, 0)),
            ],
            out_specs=pl.BlockSpec((None, 1, 128), lambda b, s_, i: (b, s_, 0)),
            scratch_shapes=[pltpu.VMEM((8, 128), jnp.float32)],
        ),
        compiler_params=pltpu.CompilerParams(
            dimension_semantics=("parallel", "parallel", "arbitrary")),
    )(x, weight, bias2d)

    # Combine per-split partial results (trivial (B,S,128) sum; bias was added
    # exactly once inside the kernel, by split 0).
    out = partials[:, 0] if S == 1 else jnp.sum(partials, axis=1)
    return out[0] if squeeze else out


if __name__ == "__main__":
    key = jax.random.PRNGKey(0)
    k_x1, k_x2, k_x3, k_x4, k_w, k_b = jax.random.split(key, 6)

    d = 128
    # Deterministic parameter init mimicking nn.Linear default:
    # U(-1/sqrt(in_features), 1/sqrt(in_features)), weight in (out, in) layout.
    bound = 1.0 / jnp.sqrt(jnp.float32(d))
    weight = jax.random.uniform(k_w, (d, d), minval=-bound, maxval=bound,
                                dtype=jnp.float32)
    bias = jax.random.uniform(k_b, (d,), minval=-bound, maxval=bound,
                              dtype=jnp.float32)

    def ref(xx):
        return jnp.mean(xx @ weight.T + bias, axis=-2)

    # 1) The module's real use case: (n=8, 128) -> (128,)  [fast path].
    x1 = jax.random.normal(k_x1, (8, d), dtype=jnp.float32)
    o1 = jax.block_until_ready(gamma_forward(x1, weight, bias))
    assert o1.shape == (d,)
    assert jnp.allclose(o1, ref(x1), atol=1e-5, rtol=1e-5), "mismatch (n=8)"

    # 2) Multi-tile + ragged last tile + auto dual-split reduction.
    #    (Tiny tile_n only to exercise these code paths at small N.)
    x2 = jax.random.normal(k_x2, (100, d), dtype=jnp.float32)
    o2 = jax.block_until_ready(gamma_forward(x2, weight, bias, tile_n=32))
    assert jnp.allclose(o2, ref(x2), atol=1e-5, rtol=1e-5), "mismatch (n=100)"

    # 3) Batched inputs sharing one launch and one resident weight/bias
    #    (B > 1 -> no split; batch axis is the parallel axis).
    x3 = jax.random.normal(k_x3, (2, 24, d), dtype=jnp.float32)
    o3 = jax.block_until_ready(gamma_forward(x3, weight, bias, tile_n=16))
    assert o3.shape == (2, d)
    assert jnp.allclose(o3, ref(x3), atol=1e-5, rtol=1e-5), "mismatch (batched)"

    # 4) Explicit dual-split with N an exact multiple of the tile
    #    (all-unmasked interior accumulate path).
    x4 = jax.random.normal(k_x4, (128, d), dtype=jnp.float32)
    o4 = jax.block_until_ready(
        gamma_forward(x4, weight, bias, tile_n=16, num_splits=2))
    assert jnp.allclose(o4, ref(x4), atol=1e-5, rtol=1e-5), "mismatch (split)"

    print("KERNEL_OK")
</pallas_src>

<mosaic_0001>
module attributes {stable_mosaic.version = 11 : i64} {
  func.func @_gamma_single_tile_kernel(%arg0: i32, %arg1: memref<1x8x128xf32, #tpu.memory_space<vmem>>, %arg2: memref<128x128xf32, #tpu.memory_space<vmem>>, %arg3: memref<1x128xf32, #tpu.memory_space<vmem>>, %arg4: memref<1x128xf32, #tpu.memory_space<vmem>>) attributes {dimension_semantics = [#tpu.dimension_semantics<parallel>], iteration_bounds = array<i64: 1>, scalar_prefetch = 0 : i64, scratch_operands = 0 : i64, tpu.core_type = #tpu.core_type<tc>, window_params = [{transform_indices = @transform_0, window_bounds = array<i64: 1, 8, 128>}, {pipeline_mode = #tpu.pipeline_mode<synchronous>, transform_indices = @transform_1, window_bounds = array<i64: 128, 128>}, {pipeline_mode = #tpu.pipeline_mode<synchronous>, transform_indices = @transform_2, window_bounds = array<i64: 1, 128>}, {transform_indices = @transform_3, window_bounds = array<i64: 1, 128>}]} {
    %c0 = arith.constant 0 : index
    %c0_0 = arith.constant 0 : index
    %c0_1 = arith.constant 0 : index
    %0 = vector.load %arg1[%c0, %c0_0, %c0_1] : memref<1x8x128xf32, #tpu.memory_space<vmem>>, vector<1x8x128xf32>
    %1 = vector.shape_cast %0 : vector<1x8x128xf32> to vector<8x128xf32>
    %2 = vector.shape_cast %1 : vector<8x128xf32> to vector<1x8x128xf32>
    %cst = arith.constant dense<0.000000e+00> : vector<8x128xf32>
    %3 = vector.multi_reduction <add>, %2, %cst [0] : vector<1x8x128xf32> to vector<8x128xf32>
    %cst_2 = arith.constant dense<0.000000e+00> : vector<128xf32>
    %4 = vector.multi_reduction <add>, %3, %cst_2 [0] : vector<8x128xf32> to vector<128xf32>
    %5 = vector.shape_cast %4 : vector<128xf32> to vector<1x128xf32>
    %cst_3 = arith.constant 1.250000e-01 : f32
    %6 = vector.broadcast %cst_3 : f32 to vector<1x128xf32>
    %7 = arith.mulf %5, %6 : vector<1x128xf32>
    %c0_4 = arith.constant 0 : index
    %c0_5 = arith.constant 0 : index
    %8 = vector.load %arg2[%c0_4, %c0_5] : memref<128x128xf32, #tpu.memory_space<vmem>>, vector<128x128xf32>
    %cst_6 = arith.constant dense<0.000000e+00> : vector<1x128xf32>
    %9 = tpu.matmul %7, %8, %cst_6 {dimension_numbers = #tpu.dot_dimension_numbers<[1], [1], [0], [0], [0, 0, 1, 0], [], []>} : vector<1x128xf32>, vector<128x128xf32>, vector<1x128xf32> -> vector<1x128xf32>
    %c0_7 = arith.constant 0 : index
    %c0_8 = arith.constant 0 : index
    %10 = vector.load %arg3[%c0_7, %c0_8] : memref<1x128xf32, #tpu.memory_space<vmem>>, vector<1x128xf32>
    %11 = arith.addf %9, %10 : vector<1x128xf32>
    %c0_9 = arith.constant 0 : index
    %c0_10 = arith.constant 0 : index
    %12 = vector.load %arg4[%c0_9, %c0_10] : memref<1x128xf32, #tpu.memory_space<vmem>>, vector<1x128xf32>
    tpu.vector_store %arg4[%c0_9, %c0_10], %11 {strides = array<i32>} : memref<1x128xf32, #tpu.memory_space<vmem>>, vector<1x128xf32>,
    return
  }
  func.func @transform_0(%arg0: i32) -> (i32, i32, i32) {
    %c0_i32 = arith.constant 0 : i32
    %c0_i32_0 = arith.constant 0 : i32
    %c0_i32_1 = arith.constant 0 : i32
    return %arg0, %c0_i32, %c0_i32_0 : i32, i32, i32
  }
  func.func @transform_1(%arg0: i32) -> (i32, i32) {
    %c0_i32 = arith.constant 0 : i32
    %c0_i32_0 = arith.constant 0 : i32
    %c0_i32_1 = arith.constant 0 : i32
    return %c0_i32, %c0_i32_0 : i32, i32
  }
  func.func @transform_2(%arg0: i32) -> (i32, i32) {
    %c0_i32 = arith.constant 0 : i32
    %c0_i32_0 = arith.constant 0 : i32
    %c0_i32_1 = arith.constant 0 : i32
    return %c0_i32, %c0_i32_0 : i32, i32
  }
  func.func @transform_3(%arg0: i32) -> (i32, i32) {
    %c0_i32 = arith.constant 0 : i32
    %c0_i32_0 = arith.constant 0 : i32
    return %arg0, %c0_i32 : i32, i32
  }
}

</mosaic_0001>

<bundles_post_ra>
// kernel: tpu_custom_call.1
= control target key start
LH: loop header
LB: loop body
LE: loop exit
PB: predicated region body
PF: predicated region fallthrough
CT: control target
= control target key end

     0   :  { %8 = vsyncpa [#allocation3], 0  ;;  %s230_s0 = inlined_call_operand.hbm [shape: f32[1,8,128], index: 0, kind: input, shape index: {}]   ;;  %s231_s1 = inlined_call_operand.hbm [shape: f32[128,128], index: 1, kind: input, shape index: {}]   ;;  %s232_s2 = inlined_call_operand.vmem [shape: f32[1,128], index: 2, kind: input, shape index: {}]   ;;  %s233_s3 = inlined_call_operand.hbm [shape: f32[1,128], index: 3, kind: output, shape index: {}]  }
   0x1   :  { %9 = vsyncpa [#allocation6], 0 }
   0x2   :  { %10 = vsyncpa [#allocation4], 0  ;;  %s16_s14 = sshll.u32 %s230_s0, 4  ;;  %s193_s15 = smov [#allocation2]   ;;  %s17_s14 = int_to_ptr.hbm [resolvable:$true] %s16_s14 }
   0x3   :  { %s18_s16 = sshll.u32 %s193_s15, 4  ;;  %s26_s19 = sshll.u32 %s231_s1, 4  ;;  %s19_s16 = int_to_ptr.vmem [resolvable:$true] %s18_s16  ;;  %s27_s19 = int_to_ptr.hbm [resolvable:$true] %s26_s19 }
   0x4   :  { %21 = dma.hbm_to_vmem [thread:$0]  %s17_s14, 128, %s19_s16, [#allocation3]  }
   0x5   :  { %s194_s20 = smov [#allocation5]   ;;  %s195_s22 = smov 128  }
   0x6   :  { %s28_s21 = sshll.u32 %s194_s20, 4  ;;  %s196_s23 = smov 8   ;;  %s29_s21 = int_to_ptr.vmem [resolvable:$true] %s28_s21 }
   0x7   :  { %34 = dma.hbm_to_vmem [thread:$0]  %s27_s19, 2048, %s29_s21, [#allocation6], %s195_s22, %s195_s22, %s196_s23  }
   0x8   :  { %187 = dma.done.wait [#allocation3], 128  }
   0x9   :  { %188 = vsyncadd [#allocation3], 4294967168 }
   0xa   :  { %189 = dma.done.wait [#allocation6], 2048  }
   0xb   :  { %190 = vsyncadd [#allocation6], 4294965248  ;;  %v69_v0 = vld [vmem:[#allocation5 + $0x78] sm:$0xff]  ;;  %v68_v1 = vld [vmem:[#allocation5 + $0x70] sm:$0xff]  ;;  %s197_s24 = smov [#allocation7]   ;;  %s99_s28 = sshll.u32 %s233_s3, 4  ;;  %s100_s28 = int_to_ptr.hbm [resolvable:$true] %s99_s28 }
   0xc   :  { %71 = vmatpush.xpose.msra.mxu0 %v69_v0  ;;  %v67_v2 = vld [vmem:[#allocation5 + $0x68] sm:$0xff]  ;;  %v66_v3 = vld [vmem:[#allocation5 + $0x60] sm:$0xff]  ;;  %v65_v4 = vld [vmem:[#allocation5 + $0x58] sm:$0xff]  ;;  %s97_s25 = sshll.u32 %s197_s24, 4  ;;  %s98_s25 = int_to_ptr.vmem [resolvable:$true] %s97_s25 }
   0xd   :  { %v64_v5 = vld [vmem:[#allocation5 + $0x50] sm:$0xff]  ;;  %v63_v6 = vld [vmem:[#allocation5 + $0x48] sm:$0xff]  ;;  %v62_v7 = vld [vmem:[#allocation5 + $0x40] sm:$0xff] }
   0xe   :  { %v61_v8 = vld [vmem:[#allocation5 + $0x38] sm:$0xff]  ;;  %v60_v10 = vld [vmem:[#allocation5 + $0x30] sm:$0xff]  ;;  %v59_v12 = vld [vmem:[#allocation5 + $0x28] sm:$0xff] }
   0xf   :  { %v45_v9 = vld [vmem:[#allocation2] sm:$0xff]  ;;  %v58_v14 = vld [vmem:[#allocation5 + $0x20] sm:$0xff]  ;;  %v56_v18 = vld [vmem:[#allocation5 + $0x10] sm:$0xff] }
  0x10   :  { %72 = vmatpush.xpose.msra.mxu0 %v68_v1  ;;  %v47_v11 = vrot.slane %v45_v9, 4  ;;  %v57_v16 = vld [vmem:[#allocation5 + $0x18] sm:$0xff]  ;;  %v55_v20 = vld [vmem:[#allocation5 + $0x8] sm:$0xff]  ;;  %v54_v22 = vld [vmem:[#allocation5] sm:$0xff] }
  0x11   :  { %v70_v24 = vld [vmem:[%s232_s2] sm:$0x1] }
  0x12   :  { %v48_v13 = vadd.f32 %v47_v11, %v45_v9 }
  0x14   :  { %73 = vmatpush.xpose.msra.mxu0 %v67_v2  ;;  %v49_v15 = vrot.slane %v48_v13, 2 }
  0x16   :  { %v50_v17 = vadd.f32 %v49_v15, %v48_v13 }
  0x18   :  { %74 = vmatpush.xpose.msra.mxu0 %v66_v3  ;;  %v51_v19 = vrot.slane %v50_v17, 1 }
  0x1a   :  { %v52_v21 = vadd.f32 %v51_v19, %v50_v17 }
  0x1c   :  { %75 = vmatpush.xpose.msra.mxu0 %v65_v4  ;;  %v53_v23 = vmul.f32 0.125, %v52_v21 }
  0x20   :  { %76 = vmatpush.xpose.msra.mxu0 %v64_v5 }
  0x24   :  { %77 = vmatpush.xpose.msra.mxu0 %v63_v6 }
  0x28   :  { %78 = vmatpush.xpose.msra.mxu0 %v62_v7 }
  0x2c   :  { %79 = vmatpush.xpose.msra.mxu0 %v61_v8 }
  0x30   :  { %80 = vmatpush.xpose.msra.mxu0 %v60_v10 }
  0x34   :  { %81 = vmatpush.xpose.msra.mxu0 %v59_v12 }
  0x38   :  { %82 = vmatpush.xpose.msra.mxu0 %v58_v14 }
  0x3c   :  { %83 = vmatpush.xpose.msra.mxu0 %v57_v16 }
  0x40   :  { %84 = vmatpush.xpose.msra.mxu0 %v56_v18 }
  0x44   :  { %85 = vmatpush.xpose.msra.mxu0 %v55_v20 }
  0x48   :  { %86 = vmatpush.xpose.msra.mxu0 %v54_v22 }
  0x4b   :  { %87 = vmatmul.f32.vlgmr.msra.gmra.mxu0 %v53_v23 }
  0xc8   :  { %v88_v25 = vpop.f32.mrf.mxu0 }
  0xc9   :  { %v89_v26 = vadd.f32 %v88_v25, %v70_v24 }
  0xcb   :  { %91 = vst [vmem:[#allocation7] sm:$0x1] %v89_v26 }
  0xcc   :  { %102 = dma.vmem_to_hbm [thread:$0]  %s98_s25, 16, %s100_s28, [#allocation4]  }
  0xcd   :  { %191 = dma.done.wait [#allocation4], 16  }
  0xce   :  { %192 = vsyncadd [#allocation4], 4294967280 }
  0xcf   :  { %107 = vsyncpa [#allocation3], 1 }
  0xd0   :  { %108 = vsyncpa [#allocation6], 1 }
  0xd1   :  { %109 = vsyncpa [#allocation4], 1 }

</bundles_post_ra>
